<compile_context>
chip_gen: v7x
topology: tpu7x:2x2x1
jax: 0.10.0
libtpu: 0.0.40
codegen_flags: <defaults>
</compile_context>

<pallas_src>
import jax
import jax.numpy as jnp
from jax.experimental import pallas as pl
from jax.experimental.pallas import tpu as pltpu


def _round_up(n, m):
    return ((n + m - 1) // m) * m


def _decoder_kernel(x_ref, w1_ref, b1_ref, w2_ref, b2_ref, o_ref):
    # Cast activations to the matmul operand dtype in-kernel (no wrapper pass).
    x = x_ref[...].astype(w1_ref.dtype)
    # ---- Linear(enc -> inter) with BN folded in; MXU, f32 accumulation ----
    h = jnp.dot(x, w1_ref[...], preferred_element_type=jnp.float32)
    # ---- fused bias-add (Linear bias + BN shift) + ReLU, f32 epilogue ----
    h = jnp.maximum(h + b1_ref[...], 0.0)
    # ---- Dropout(0.2): identity in eval mode ----
    # TODO(synk): training-mode dropout would use pltpu.prng_random_bits.
    # ---- Linear(inter -> out) with BN folded in; MXU, f32 accumulation ----
    y = jnp.dot(h.astype(w2_ref.dtype), w2_ref[...],
                preferred_element_type=jnp.float32)
    y = y + b2_ref[...]
    # ---- Sigmoid (EUP) + store ----
    o_ref[...] = jax.nn.sigmoid(y).astype(o_ref.dtype)


def prepare_decoder_params(params, *, matmul_dtype=jnp.bfloat16,
                           lane_multiple=128, eps=1e-5):
    """One-time prep: fold BatchNorm1d (eval mode) into the Linears, transpose
    to (in, out) layout and zero-pad output-feature dims to lane multiples.
    Do this ONCE (outside the per-step forward path)."""
    (w1, b1, g1, be1, rm1, rv1, w2, b2, g2, be2, rm2, rv2) = params
    inter, enc = w1.shape
    out = w2.shape[0]

    # (x @ W.T + b) * s + t  ==  x @ (W.T * s) + (b * s + t)
    s1 = g1 * jax.lax.rsqrt(rv1 + eps)
    t1 = be1 - rm1 * s1
    s2 = g2 * jax.lax.rsqrt(rv2 + eps)
    t2 = be2 - rm2 * s2
    w1f = (w1.T * s1[None, :]).astype(jnp.float32)   # (enc, inter)
    b1f = (b1 * s1 + t1).astype(jnp.float32)          # (inter,)
    w2f = (w2.T * s2[None, :]).astype(jnp.float32)   # (inter, out)
    b2f = (b2 * s2 + t2).astype(jnp.float32)          # (out,)

    # Pad only the output-feature dims (lane-dense stores / MXU N dims).  The
    # contraction dim of matmul 1 (enc) stays at its true extent: K must not be
    # ragged-padded, and leaving it unpadded avoids inflating x/W1 HBM bytes.
    # (On v6e/v7x, lane_multiple=256 can be used when the extra pad is cheap.)
    inter_p = _round_up(inter, lane_multiple)
    out_p = _round_up(out, lane_multiple)

    w1p = jnp.zeros((enc, inter_p), jnp.float32).at[:, :inter].set(w1f)
    w2p = jnp.zeros((inter_p, out_p), jnp.float32).at[:inter, :out].set(w2f)
    b1p = jnp.zeros((1, inter_p), jnp.float32).at[0, :inter].set(b1f)
    b2p = jnp.zeros((1, out_p), jnp.float32).at[0, :out].set(b2f)

    return {
        "w1": w1p.astype(matmul_dtype), "b1": b1p,
        "w2": w2p.astype(matmul_dtype), "b2": b2p,
        "enc": enc, "inter": inter, "out": out,
        "inter_p": inter_p, "out_p": out_p,
    }


def decoder_forward(x, prep, *, out_dtype=None, tile_b=512):
    """x: (B, encoding_size).  prep: result of prepare_decoder_params.
    Returns (B, output_size) in out_dtype (default x.dtype; bf16 is a valid
    store-bandwidth option on v5e since sigmoid outputs live in [0, 1])."""
    assert x.ndim == 2
    if out_dtype is None:
        out_dtype = x.dtype
    B, enc = x.shape
    assert enc == prep["enc"], "encoding size mismatch"
    w1p, b1p, w2p, b2p = prep["w1"], prep["b1"], prep["w2"], prep["b2"]
    inter_p, out_p, out = prep["inter_p"], prep["out_p"], prep["out"]

    # Balanced batch tiling: no up-to-tile over-padding, and >= 2 grid steps
    # whenever B permits so ("parallel",) keeps both v7x TensorCores busy.
    tb_cap = max(16, _round_up(int(tile_b), 16))
    n_steps = max(1, pl.cdiv(B, tb_cap))
    if B >= 32 and n_steps < 2:
        n_steps = 2
    tb = _round_up(pl.cdiv(B, n_steps), 16)
    tb = min(tb, _round_up(B, 8))
    grid = (pl.cdiv(B, tb),)

    # VMEM budget: single-buffered resident weights/biases + double-buffered
    # streamed x/out tiles + in-kernel f32 intermediates, with headroom.
    mm_bytes = jnp.dtype(w1p.dtype).itemsize
    out_bytes = jnp.dtype(out_dtype).itemsize
    resident = (w1p.size + w2p.size) * mm_bytes + (b1p.size + b2p.size) * 4
    streamed = 2 * tb * (enc * x.dtype.itemsize + out_p * out_bytes)
    scratch = tb * (inter_p + out_p) * 4
    needed = resident + streamed + scratch
    vmem_limit = int(min(100 * 2**20,
                         max(32 * 2**20, needed * 5 // 4 + (4 << 20))))

    flops = 2 * B * (enc * inter_p + inter_p * out_p)
    bytes_accessed = int(B * enc * x.dtype.itemsize + resident
                         + B * out_p * out_bytes)

    def resident_spec(shape):
        # Constant index_map -> fetched once; single buffer halves its VMEM.
        return pl.BlockSpec(shape, lambda i: (0, 0),
                            pipeline_mode=pl.Buffered(1))

    y_padded = pl.pallas_call(
        _decoder_kernel,
        out_shape=jax.ShapeDtypeStruct((B, out_p), out_dtype),
        grid=grid,
        in_specs=[
            pl.BlockSpec((tb, enc), lambda i: (i, 0)),   # x tile (streamed)
            resident_spec((enc, inter_p)),               # W1 (resident)
            resident_spec((1, inter_p)),                 # b1 (resident)
            resident_spec((inter_p, out_p)),             # W2 (resident)
            resident_spec((1, out_p)),                   # b2 (resident)
        ],
        out_specs=pl.BlockSpec((tb, out_p), lambda i: (i, 0)),
        compiler_params=pltpu.CompilerParams(
            dimension_semantics=("parallel",),
            vmem_limit_bytes=vmem_limit),
        cost_estimate=pl.CostEstimate(
            flops=flops, transcendentals=B * out_p,
            bytes_accessed=bytes_accessed),
    )(x, w1p, b1p, w2p, b2p)

    # TODO(synk): for decoders where resident W2 (inter_p x out_p) exceeds the
    # VMEM budget (esp. v7x's 64 MiB), add an inner grid axis over out_p tiles.
    if out_p != out:
        y_padded = y_padded[:, :out]
    return y_padded


def init_params(key, output_size, intermediate_size, encoding_size):
    ks = jax.random.split(key, 12)
    w1 = jax.random.normal(ks[0], (intermediate_size, encoding_size), jnp.float32) * 0.1
    b1 = jax.random.normal(ks[1], (intermediate_size,), jnp.float32) * 0.1
    g1 = 1.0 + 0.1 * jax.random.normal(ks[2], (intermediate_size,), jnp.float32)
    be1 = 0.1 * jax.random.normal(ks[3], (intermediate_size,), jnp.float32)
    rm1 = 0.05 * jax.random.normal(ks[4], (intermediate_size,), jnp.float32)
    rv1 = jnp.abs(1.0 + 0.1 * jax.random.normal(ks[5], (intermediate_size,), jnp.float32))
    w2 = jax.random.normal(ks[6], (output_size, intermediate_size), jnp.float32) * 0.1
    b2 = jax.random.normal(ks[7], (output_size,), jnp.float32) * 0.1
    g2 = 1.0 + 0.1 * jax.random.normal(ks[8], (output_size,), jnp.float32)
    be2 = 0.1 * jax.random.normal(ks[9], (output_size,), jnp.float32)
    rm2 = 0.05 * jax.random.normal(ks[10], (output_size,), jnp.float32)
    rv2 = jnp.abs(1.0 + 0.1 * jax.random.normal(ks[11], (output_size,), jnp.float32))
    return (w1, b1, g1, be1, rm1, rv1, w2, b2, g2, be2, rm2, rv2)


def reference_forward(x, params):
    """Plain-JAX reference mirroring the PyTorch eval-mode forward."""
    (w1, b1, g1, be1, rm1, rv1, w2, b2, g2, be2, rm2, rv2) = params
    eps = 1e-5
    h = x @ w1.T + b1
    h = (h - rm1) / jnp.sqrt(rv1 + eps) * g1 + be1
    h = jnp.maximum(h, 0.0)
    y = h @ w2.T + b2
    y = (y - rm2) / jnp.sqrt(rv2 + eps) * g2 + be2
    return jax.nn.sigmoid(y)


if __name__ == "__main__":
    batch = 8
    encoding_size = 16
    intermediate_size = 32
    output_size = 64

    key = jax.random.PRNGKey(0)
    kx, kp = jax.random.split(key)
    x = jax.random.normal(kx, (batch, encoding_size), jnp.float32)
    params = init_params(kp, output_size, intermediate_size, encoding_size)

    ref = reference_forward(x, params)

    # Default path: bf16 matmul operands (right MXU dtype on v5e/v6e/v7x),
    # f32 accumulation + epilogue.  Weight prep happens once, outside jit.
    prep_bf16 = prepare_decoder_params(params)
    fwd_bf16 = jax.jit(lambda xx: decoder_forward(xx, prep_bf16))
    out_bf16 = jax.block_until_ready(fwd_bf16(x))
    assert out_bf16.shape == (batch, output_size)
    assert jnp.allclose(out_bf16, ref, atol=2e-2, rtol=2e-2), "bf16 mismatch vs reference"

    # f32 matmul-operand path: tight tolerance against the reference.
    prep_f32 = prepare_decoder_params(params, matmul_dtype=jnp.float32)
    fwd_f32 = jax.jit(lambda xx: decoder_forward(xx, prep_f32))
    out_f32 = jax.block_until_ready(fwd_f32(x))
    assert out_f32.shape == (batch, output_size)
    assert jnp.allclose(out_f32, ref, atol=1e-5, rtol=1e-5), "f32 mismatch vs reference"

    print("KERNEL_OK")
</pallas_src>

<mosaic_0001>
module attributes {stable_mosaic.version = 11 : i64} {
  func.func @_decoder_kernel(%arg0: i32, %arg1: memref<8x16xf32, #tpu.memory_space<vmem>>, %arg2: memref<16x128xbf16, #tpu.memory_space<vmem>>, %arg3: memref<1x128xf32, #tpu.memory_space<vmem>>, %arg4: memref<128x128xbf16, #tpu.memory_space<vmem>>, %arg5: memref<1x128xf32, #tpu.memory_space<vmem>>, %arg6: memref<8x128xf32, #tpu.memory_space<vmem>>) attributes {dimension_semantics = [#tpu.dimension_semantics<parallel>], iteration_bounds = array<i64: 1>, scalar_prefetch = 0 : i64, scratch_operands = 0 : i64, tpu.core_type = #tpu.core_type<tc>, window_params = [{transform_indices = @transform_0, window_bounds = array<i64: 8, 16>}, {pipeline_mode = #tpu.pipeline_mode<synchronous>, transform_indices = @transform_1, window_bounds = array<i64: 16, 128>}, {pipeline_mode = #tpu.pipeline_mode<synchronous>, transform_indices = @transform_2, window_bounds = array<i64: 1, 128>}, {pipeline_mode = #tpu.pipeline_mode<synchronous>, transform_indices = @transform_3, window_bounds = array<i64: 128, 128>}, {pipeline_mode = #tpu.pipeline_mode<synchronous>, transform_indices = @transform_4, window_bounds = array<i64: 1, 128>}, {transform_indices = @transform_5, window_bounds = array<i64: 8, 128>}]} {
    %c0 = arith.constant 0 : index
    %c0_0 = arith.constant 0 : index
    %0 = vector.load %arg1[%c0, %c0_0] : memref<8x16xf32, #tpu.memory_space<vmem>>, vector<8x16xf32>
    %1 = arith.truncf %0 : vector<8x16xf32> to vector<8x16xbf16>
    %c0_1 = arith.constant 0 : index
    %c0_2 = arith.constant 0 : index
    %2 = vector.load %arg2[%c0_1, %c0_2] : memref<16x128xbf16, #tpu.memory_space<vmem>>, vector<16x128xbf16>
    %cst = arith.constant dense<0.000000e+00> : vector<8x128xf32>
    %3 = tpu.matmul %1, %2, %cst {dimension_numbers = #tpu.dot_dimension_numbers<[1], [0], [0], [1], [0, 0, 1, 1], [], []>} : vector<8x16xbf16>, vector<16x128xbf16>, vector<8x128xf32> -> vector<8x128xf32>
    %c0_3 = arith.constant 0 : index
    %c0_4 = arith.constant 0 : index
    %4 = vector.load %arg3[%c0_3, %c0_4] : memref<1x128xf32, #tpu.memory_space<vmem>>, vector<1x128xf32>
    %5 = vector.broadcast %4 : vector<1x128xf32> to vector<8x128xf32>
    %6 = arith.addf %3, %5 : vector<8x128xf32>
    %cst_5 = arith.constant 0.000000e+00 : f32
    %7 = vector.broadcast %cst_5 : f32 to vector<8x128xf32>
    %8 = arith.maximumf %6, %7 : vector<8x128xf32>
    %9 = arith.truncf %8 : vector<8x128xf32> to vector<8x128xbf16>
    %c0_6 = arith.constant 0 : index
    %c0_7 = arith.constant 0 : index
    %10 = vector.load %arg4[%c0_6, %c0_7] : memref<128x128xbf16, #tpu.memory_space<vmem>>, vector<128x128xbf16>
    %cst_8 = arith.constant dense<0.000000e+00> : vector<8x128xf32>
    %11 = tpu.matmul %9, %10, %cst_8 {dimension_numbers = #tpu.dot_dimension_numbers<[1], [0], [0], [1], [0, 0, 1, 1], [], []>} : vector<8x128xbf16>, vector<128x128xbf16>, vector<8x128xf32> -> vector<8x128xf32>
    %c0_9 = arith.constant 0 : index
    %c0_10 = arith.constant 0 : index
    %12 = vector.load %arg5[%c0_9, %c0_10] : memref<1x128xf32, #tpu.memory_space<vmem>>, vector<1x128xf32>
    %13 = vector.broadcast %12 : vector<1x128xf32> to vector<8x128xf32>
    %14 = arith.addf %11, %13 : vector<8x128xf32>
    %15 = arith.negf %14 : vector<8x128xf32>
    %16 = math.exp %15 : vector<8x128xf32>
    %cst_11 = arith.constant 1.000000e+00 : f32
    %17 = vector.broadcast %cst_11 : f32 to vector<8x128xf32>
    %18 = arith.addf %17, %16 : vector<8x128xf32>
    %19 = arith.divf %17, %18 : vector<8x128xf32>
    %c0_12 = arith.constant 0 : index
    %c0_13 = arith.constant 0 : index
    %20 = vector.load %arg6[%c0_12, %c0_13] : memref<8x128xf32, #tpu.memory_space<vmem>>, vector<8x128xf32>
    tpu.vector_store %arg6[%c0_12, %c0_13], %19 {strides = array<i32>} : memref<8x128xf32, #tpu.memory_space<vmem>>, vector<8x128xf32>,
    return
  }
  func.func @transform_0(%arg0: i32) -> (i32, i32) {
    %c0_i32 = arith.constant 0 : i32
    %c0_i32_0 = arith.constant 0 : i32
    return %arg0, %c0_i32 : i32, i32
  }
  func.func @transform_1(%arg0: i32) -> (i32, i32) {
    %c0_i32 = arith.constant 0 : i32
    %c0_i32_0 = arith.constant 0 : i32
    %c0_i32_1 = arith.constant 0 : i32
    return %c0_i32, %c0_i32_0 : i32, i32
  }
  func.func @transform_2(%arg0: i32) -> (i32, i32) {
    %c0_i32 = arith.constant 0 : i32
    %c0_i32_0 = arith.constant 0 : i32
    %c0_i32_1 = arith.constant 0 : i32
    return %c0_i32, %c0_i32_0 : i32, i32
  }
  func.func @transform_3(%arg0: i32) -> (i32, i32) {
    %c0_i32 = arith.constant 0 : i32
    %c0_i32_0 = arith.constant 0 : i32
    %c0_i32_1 = arith.constant 0 : i32
    return %c0_i32, %c0_i32_0 : i32, i32
  }
  func.func @transform_4(%arg0: i32) -> (i32, i32) {
    %c0_i32 = arith.constant 0 : i32
    %c0_i32_0 = arith.constant 0 : i32
    %c0_i32_1 = arith.constant 0 : i32
    return %c0_i32, %c0_i32_0 : i32, i32
  }
  func.func @transform_5(%arg0: i32) -> (i32, i32) {
    %c0_i32 = arith.constant 0 : i32
    %c0_i32_0 = arith.constant 0 : i32
    return %arg0, %c0_i32 : i32, i32
  }
}

</mosaic_0001>

<bundles_post_ra>
// kernel: _lambda_.1
= control target key start
LH: loop header
LB: loop body
LE: loop exit
PB: predicated region body
PF: predicated region fallthrough
CT: control target
= control target key end

     0   :  { %10 = vsyncpa [#allocation3], 0  ;;  %s476_s0 = inlined_call_operand.hbm [shape: f32[8,16], index: 0, kind: input, shape index: {}]   ;;  %s477_s1 = inlined_call_operand.vmem [shape: bf16[16,128], index: 1, kind: input, shape index: {}]   ;;  %s478_s2 = inlined_call_operand.vmem [shape: f32[1,128], index: 2, kind: input, shape index: {}]   ;;  %s479_s3 = inlined_call_operand.hbm [shape: bf16[128,128], index: 3, kind: input, shape index: {}]   ;;  %s480_s4 = inlined_call_operand.vmem [shape: f32[1,128], index: 4, kind: input, shape index: {}]   ;;  %s481_s5 = inlined_call_operand.hbm [shape: f32[8,128], index: 5, kind: output, shape index: {}]  }
   0x1   :  { %11 = vsyncpa [#allocation6], 0 }
   0x2   :  { %12 = vsyncpa [#allocation4], 0  ;;  %s387_s18 = smov [#allocation2]   ;;  %s388_s20 = smov [#allocation5]  }
   0x3   :  { %s19_s19 = sshll.u32 %s387_s18, 4  ;;  %s32_s21 = sshll.u32 %s388_s20, 4  ;;  %s20_s19 = int_to_ptr.vmem [resolvable:$true] %s19_s19  ;;  %s424_s21 = int_to_ptr.vmem [resolvable:$true] %s32_s21 }
   0x4   :  { %s315_s24 = scalar_lea.hbm %s476_s0, 128 }
   0x5   :  { %p316_p0 = scmp.ne.s32.totalorder %s476_s0, %s315_s24  ;;  %p319_p1 = scmp.lt.u32.totalorder %s315_s24, %s476_s0 }
   0x7   :  { %p321_p2 = pnand %p319_p1, %p316_p0 }
   0x9   :  { %324 = shalt.err (!%p321_p2)
}
   0xa   :  { %s325_s29 = scalar_lea.vmem %s20_s19, 128  ;;  %p330_p4 = scmp.lt.s32.totalorder %s20_s19, %s20_s19 }
   0xb   :  { %p326_p3 = scmp.ne.s32.totalorder %s20_s19, %s325_s29  ;;  %p331_p5 = scmp.lt.s32.totalorder %s325_s29, %s325_s29 }
   0xd   :  { %p332_p6 = por %p331_p5, %p330_p4 }
   0xf   :  { %p333_p7 = pnand %p332_p6, %p326_p3 }
  0x11   :  { %336 = shalt.err (!%p333_p7)
}
  0x12   :  { %22 = dma.hbm_to_vmem [thread:$0]  %s476_s0, 128, %s20_s19, [#allocation3]  }
  0x13   :  { %s337_s9 = scalar_lea.hbm %s479_s3, 1024 }
  0x14   :  { %p338_p8 = scmp.ne.s32.totalorder %s479_s3, %s337_s9  ;;  %p341_p9 = scmp.lt.u32.totalorder %s337_s9, %s479_s3 }
  0x16   :  { %p343_p10 = pnand %p341_p9, %p338_p8 }
  0x18   :  { %346 = shalt.err (!%p343_p10)
}
  0x19   :  { %s347_s14 = scalar_lea.vmem %s424_s21, 1024  ;;  %p352_p12 = scmp.lt.s32.totalorder %s424_s21, %s424_s21 }
  0x1a   :  { %p348_p11 = scmp.ne.s32.totalorder %s424_s21, %s347_s14  ;;  %p353_p13 = scmp.lt.s32.totalorder %s347_s14, %s347_s14 }
  0x1c   :  { %p354_p0 = por %p353_p13, %p352_p12 }
  0x1e   :  { %p355_p1 = pnand %p354_p0, %p348_p11 }
  0x20   :  { %358 = shalt.err (!%p355_p1)
}
  0x21   :  { %s389_s0 = smov 64   ;;  %s390_s15 = smov 4  }
  0x22   :  { %38 = dma.hbm_to_vmem [thread:$0]  %s479_s3, 1024, %s424_s21, [#allocation6], %s389_s0, %s389_s0, %s390_s15  }
  0x23   :  { %381 = dma.done.wait [#allocation3], 128  }
  0x24   :  { %382 = vsyncadd [#allocation3], 4294967168 }
  0x25   :  { %383 = dma.done.wait [#allocation6], 1024  }
  0x26   :  { %384 = vsyncadd [#allocation6], 4294966272  ;;  %v391_v0 = vmov 0.0   ;;  %vm392_vm0 = vmmov 0   ;;  %v302_v1 = vld [vmem:[%s477_s1] sm:$0xff]   ;;  %vm65_vm1 = vcmask 130048  }
  0x27   :  { %269 = vmatprep.subr.bf16.mxu0 %v391_v0  ;;  %271 = vmatprep.mubr.msk.bf16.mxu0 %vm392_vm0, %v391_v0  ;;  %v48_v2 = vld [vmem:[#allocation2] sm:$0xff]  ;;  %v303_v4 = vld [vmem:[#allocation5] sm:$0xff]   ;;  %v304_v5 = vld [vmem:[#allocation5 + $0x8] sm:$0xff]  }
  0x28   :  { %275 = vmatprep.subr.bf16.mxu1 %v391_v0  ;;  %291 = vmatprep.mubr.msk.bf16.mxu1 %vm392_vm0, %v391_v0  ;;  %v49_v3 = vpack.c.bf16 %v48_v2, %v48_v2  ;;  %v305_v6 = vld [vmem:[#allocation5 + $0x10] sm:$0xff]   ;;  %v306_v7 = vld [vmem:[#allocation5 + $0x18] sm:$0xff]   ;;  %v307_v8 = vld [vmem:[#allocation5 + $0x20] sm:$0xff]  }
  0x29   :  { %270 = vmatpush3.bf16.msra.mxu0 %v302_v1  ;;  %276 = vmatpush3.bf16.msra.mxu1 %v303_v4  ;;  %v308_v9 = vld [vmem:[#allocation5 + $0x28] sm:$0xff]   ;;  %v309_v10 = vld [vmem:[#allocation5 + $0x30] sm:$0xff]   ;;  %v310_v11 = vld [vmem:[#allocation5 + $0x38] sm:$0xff]  }
  0x2a   :  { %277 = vmatprep.subr.bf16.mxu1 %v391_v0  ;;  %v245_v12 = vld [vmem:[%s478_s2] ss:$0 sm:$0xff]  ;;  %s393_s2 = smov [#allocation7]  }
  0x2b   :  { %v248_v20 = vld [vmem:[%s480_s4] ss:$0 sm:$0xff]  ;;  %s235_s22 = sshll.u32 %s393_s2, 4  ;;  %s236_s22 = int_to_ptr.vmem [resolvable:$true] %s235_s22 }
  0x2c   :  { %272 = vmatmul.mubr.msk.bf16.vlgmr.msra.gmra.mrb[0].mxu0 %vm65_vm1, %v49_v3  ;;  %s359_s23 = scalar_lea.vmem %s236_s22, 128  ;;  %p364_p3 = scmp.lt.s32.totalorder %s236_s22, %s236_s22 }
  0x2d   :  { %278 = vmatpush3.bf16.msra.mxu1 %v304_v5  ;;  %p360_p2 = scmp.ne.s32.totalorder %s236_s22, %s359_s23  ;;  %p365_p4 = scmp.lt.s32.totalorder %s359_s23, %s359_s23 }
  0x2e   :  { %279 = vmatprep.subr.bf16.mxu1 %v391_v0 }
  0x2f   :  { %p366_p5 = por %p365_p4, %p364_p3 }
  0x31   :  { %280 = vmatpush3.bf16.msra.mxu1 %v305_v6  ;;  %p367_p6 = pnand %p366_p5, %p360_p2 }
  0x32   :  { %281 = vmatprep.subr.bf16.mxu1 %v391_v0 }
  0x35   :  { %282 = vmatpush3.bf16.msra.mxu1 %v306_v7 }
  0x36   :  { %283 = vmatprep.subr.bf16.mxu1 %v391_v0 }
  0x39   :  { %284 = vmatpush3.bf16.msra.mxu1 %v307_v8 }
  0x3a   :  { %285 = vmatprep.subr.bf16.mxu1 %v391_v0 }
  0x3d   :  { %286 = vmatpush3.bf16.msra.mxu1 %v308_v9 }
  0x3e   :  { %287 = vmatprep.subr.bf16.mxu1 %v391_v0 }
  0x41   :  { %288 = vmatpush3.bf16.msra.mxu1 %v309_v10 }
  0x42   :  { %289 = vmatprep.subr.bf16.mxu1 %v391_v0 }
  0x45   :  { %290 = vmatpush3.bf16.msra.mxu1 %v310_v11 }
  0xff   :  { %v103_v13 = vpop.f32.mrb[0].mxu0 }
 0x100   :  { %v104_v14 = vadd.f32 %v245_v12, %v103_v13  ;;  %v273_v15 = vpop.f32.mrb[1].mxu0 }
 0x101   :  { %v106_v16 = vpop.f32.mrb[2].mxu0 }
 0x102   :  { %v109_v17 = vmax.f32 %v104_v14, 0.0  ;;  %v274_v18 = vpop.f32.mrb[3].mxu0 }
 0x104   :  { %v110_v19 = vpack.c.bf16 %v109_v17, %v109_v17 }
 0x106   :  { %292 = vmatmul.mubr.bf16.vlgmr.msra.gmra.mrb[0].mxu1 %v110_v19 }
 0x1d9   :  { %v216_v21 = vpop.f32.mrb[0].mxu1 }
 0x1da   :  { %v217_v22 = vadd.f32 %v248_v20, %v216_v21  ;;  %v293_v23 = vpop.f32.mrb[1].mxu1 }
 0x1db   :  { %v219_v24 = vpop.f32.mrb[2].mxu1 }
 0x1dc   :  { %v257_v25 = vmul.f32 -1.442695, %v217_v22  ;;  %v294_v26 = vpop.f32.mrb[3].mxu1 }
 0x1de   :  { %311 = vpow2.f32 %v257_v25 }
 0x1e8   :  { %v312_v27 = vpop.eup %311 }
 0x1e9   :  { %v225_v28 = vadd.f32 1.0, %v312_v27 }
 0x1eb   :  { %313 = vrcp.f32 %v225_v28 }
 0x1f5   :  { %v314_v29 = vpop.eup %313 }
 0x1f6   :  { %228 = vst [vmem:[#allocation7] sm:$0xff] %v314_v29 }
 0x1f7   :  { %370 = shalt.err (!%p367_p6)
}
 0x1f8   :  { %s371_s25 = scalar_lea.hbm %s481_s5, 128 }
 0x1f9   :  { %p372_p7 = scmp.ne.s32.totalorder %s481_s5, %s371_s25  ;;  %p375_p8 = scmp.lt.u32.totalorder %s371_s25, %s481_s5 }
 0x1fb   :  { %p377_p9 = pnand %p375_p8, %p372_p7 }
 0x1fd   :  { %380 = shalt.err (!%p377_p9)
}
 0x1fe   :  { %238 = dma.vmem_to_hbm [thread:$0]  %s236_s22, 128, %s481_s5, [#allocation4]  }
 0x1ff   :  { %385 = dma.done.wait [#allocation4], 128  }
 0x200   :  { %386 = vsyncadd [#allocation4], 4294967168 }
 0x201   :  { %242 = vsyncpa [#allocation3], 1 }
 0x202   :  { %243 = vsyncpa [#allocation6], 1 }
 0x203   :  { %244 = vsyncpa [#allocation4], 1 }

</bundles_post_ra>
